<compile_context>
chip_gen: v7x
topology: tpu7x:2x2x1
jax: 0.10.0
libtpu: 0.0.40
codegen_flags: <defaults>
</compile_context>

<pallas_src>
import functools

import jax
import jax.numpy as jnp
from jax import lax
from jax.experimental import pallas as pl
from jax.experimental.pallas import tpu as pltpu

BN_EPS = 1e-5
GIN_EPS = 0.0   # pygnn.GINEConv default eps


def _round_up(v, m):
    return ((v + m - 1) // m) * m


# ---------------------------------------------------------------------------
# Kernel 1: GINE message passing + 'add' aggregation.
# Grid: (n_edge_chunks,) — reduction over edge chunks into a VMEM-resident agg.
# Gather and scatter are one-hot MXU matmuls (no per-edge scalar loop, no RMW).
# ---------------------------------------------------------------------------
def aggregate_kernel(src_ref, dst_ref, x_ref, ea_ref, agg_ref):
    j = pl.program_id(0)
    n_pad = x_ref.shape[0]
    e_chunk = ea_ref.shape[0]

    @pl.when(j == 0)
    def _init():
        agg_ref[...] = jnp.zeros_like(agg_ref)

    # Gather x[src] for this edge chunk: one-hot (e_chunk, N) @ x (N, D).
    node_cols = lax.broadcasted_iota(jnp.int32, (e_chunk, n_pad), 1)
    oh_src = (node_cols == src_ref[...]).astype(jnp.float32)      # (e_chunk, n_pad)
    x_src = jnp.dot(oh_src, x_ref[...],
                    preferred_element_type=jnp.float32,
                    precision=lax.Precision.HIGHEST)               # (e_chunk, D)

    # GINE message: ReLU(x_src + edge_attr)  (vectorized over the whole chunk).
    msg = jnp.maximum(x_src + ea_ref[...], 0.0)                    # (e_chunk, D)

    # Scatter-add ('add' aggregation): one-hot (N, e_chunk) @ msg (e_chunk, D).
    # Padded edges carry dst = -1, which matches no node row -> contribute 0.
    node_rows = lax.broadcasted_iota(jnp.int32, (n_pad, e_chunk), 0)
    oh_dst = (node_rows == dst_ref[...]).astype(jnp.float32)       # (n_pad, e_chunk)
    agg_ref[...] += jnp.dot(oh_dst, msg,
                            preferred_element_type=jnp.float32,
                            precision=lax.Precision.HIGHEST)


# ---------------------------------------------------------------------------
# Kernel 2 (fused): gin_nn MLP + residual + BatchNorm1d, 3-phase grid.
#   phase 0: h = x + MLP((1+eps)x + agg); store h to VMEM scratch; accumulate sum
#   phase 1: accumulate sum((h - mean)^2)   (two-pass variance, no cancellation)
#   phase 2: out = h * scale + shift         (scale/shift folded from stats)
# h never round-trips to HBM.
# ---------------------------------------------------------------------------
def fused_mlp_bn_kernel(x_ref, agg_ref, w1_ref, b1_ref, w2_ref, b2_ref,
                        gamma_ref, beta_ref, out_ref,
                        h_scr, psum_ref, psq_ref, *, tile_n, n_valid, inv_n):
    p = pl.program_id(0)     # phase
    i = pl.program_id(1)     # node tile

    @pl.when((p == 0) & (i == 0))
    def _init():
        psum_ref[...] = jnp.zeros_like(psum_ref)
        psq_ref[...] = jnp.zeros_like(psq_ref)

    # Mask for zero-padded node rows: they must not pollute the BN statistics.
    row_ids = i * tile_n + lax.broadcasted_iota(jnp.int32, (tile_n, 1), 0)
    valid = (row_ids < n_valid).astype(jnp.float32)                # (tile_n, 1)

    @pl.when(p == 0)
    def _mlp():
        x = x_ref[...]
        z = (1.0 + GIN_EPS) * x + agg_ref[...]
        h1 = jnp.maximum(
            jnp.dot(z, w1_ref[...], preferred_element_type=jnp.float32,
                    precision=lax.Precision.HIGHEST) + b1_ref[...], 0.0)
        h = x + jnp.dot(h1, w2_ref[...], preferred_element_type=jnp.float32,
                        precision=lax.Precision.HIGHEST) + b2_ref[...]
        h_scr[i] = h
        psum_ref[...] += jnp.sum(h * valid, axis=0, keepdims=True)

    @pl.when(p == 1)
    def _var():
        mean = psum_ref[...] * inv_n                               # (1, D)
        d = (h_scr[i] - mean) * valid
        psq_ref[...] += jnp.sum(d * d, axis=0, keepdims=True)

    @pl.when(p == 2)
    def _apply():
        mean = psum_ref[...] * inv_n
        var = psq_ref[...] * inv_n                                 # biased variance
        scale = gamma_ref[...] * lax.rsqrt(var + BN_EPS)           # (1, D)
        shift = beta_ref[...] - mean * scale
        out_ref[...] = h_scr[i] * scale + shift


# ---------------------------------------------------------------------------
# Wrapper
# ---------------------------------------------------------------------------
def local_model_gine(x, edge_attr, src, dst, params, *, tile_n=None, e_chunk=256):
    """GINE branch of LocalModel.  params = (w1, b1, w2, b2, gamma, beta) with
    w1/w2 in (in, out) layout (i.e. the transpose of nn.Linear.weight)."""
    N, D = x.shape
    E = src.shape[0]
    w1, b1, w2, b2, gamma, beta = params
    f32 = jnp.float32

    # Node tiling: 256-row tiles for large graphs (MXU-filling, low grid
    # overhead); small graphs just round up to the 8-row sublane granule.
    if tile_n is None:
        tile_n = 256 if N >= 256 else _round_up(N, 8)
    tile_n = max(8, _round_up(tile_n, 8))
    N_pad = _round_up(N, tile_n)
    n_tiles = N_pad // tile_n

    # Edge chunking bounds VMEM residency of edge_attr / indices regardless of E.
    e_chunk = max(8, min(e_chunk, _round_up(E, 8)))
    E_pad = _round_up(E, e_chunk)
    n_chunks = E_pad // e_chunk

    xp = jnp.pad(x.astype(f32), ((0, N_pad - N), (0, 0)))                  # (N_pad, D)
    eap = jnp.pad(edge_attr.astype(f32), ((0, E_pad - E), (0, 0)))         # (E_pad, D)
    # Padded edges: src -> 0 (harmless gather), dst -> -1 (matches no node).
    src_col = jnp.pad(src.astype(jnp.int32), (0, E_pad - E)).reshape(E_pad, 1)
    dst_row = jnp.pad(dst.astype(jnp.int32), (0, E_pad - E),
                      constant_values=-1).reshape(1, E_pad)

    w1p = w1.astype(f32)
    w2p = w2.astype(f32)
    b1p = b1.astype(f32).reshape(1, D)
    b2p = b2.astype(f32).reshape(1, D)
    gp = gamma.astype(f32).reshape(1, D)
    bp = beta.astype(f32).reshape(1, D)

    # ---- Kernel 1: message passing + aggregation (edge chunks streamed) ----
    agg = pl.pallas_call(
        aggregate_kernel,
        out_shape=jax.ShapeDtypeStruct((N_pad, D), f32),
        grid=(n_chunks,),
        in_specs=[
            pl.BlockSpec((e_chunk, 1), lambda j: (j, 0)),      # src chunk (column)
            pl.BlockSpec((1, e_chunk), lambda j: (0, j)),      # dst chunk (row)
            pl.BlockSpec((N_pad, D), lambda j: (0, 0)),        # x, fully resident
            pl.BlockSpec((e_chunk, D), lambda j: (j, 0)),      # edge_attr chunk
        ],
        out_specs=pl.BlockSpec((N_pad, D), lambda j: (0, 0)),  # resident accumulator
        compiler_params=pltpu.CompilerParams(
            dimension_semantics=("arbitrary",)),
    )(src_col, dst_row, xp, eap)

    # ---- Kernel 2: fused gin_nn MLP + residual + BatchNorm1d (3 phases) ----
    # x/agg are only fetched in phase 0; the output block only advances in
    # phase 2 — no wasted HBM traffic in the intermediate phases.
    out_p = pl.pallas_call(
        functools.partial(fused_mlp_bn_kernel,
                          tile_n=tile_n, n_valid=N, inv_n=1.0 / N),
        out_shape=jax.ShapeDtypeStruct((N_pad, D), f32),
        grid=(3, n_tiles),
        in_specs=[
            pl.BlockSpec((tile_n, D), lambda p, i: (jnp.where(p == 0, i, 0), 0)),  # x
            pl.BlockSpec((tile_n, D), lambda p, i: (jnp.where(p == 0, i, 0), 0)),  # agg
            pl.BlockSpec((D, D), lambda p, i: (0, 0)),    # W1 (resident)
            pl.BlockSpec((1, D), lambda p, i: (0, 0)),    # b1
            pl.BlockSpec((D, D), lambda p, i: (0, 0)),    # W2
            pl.BlockSpec((1, D), lambda p, i: (0, 0)),    # b2
            pl.BlockSpec((1, D), lambda p, i: (0, 0)),    # gamma
            pl.BlockSpec((1, D), lambda p, i: (0, 0)),    # beta
        ],
        out_specs=pl.BlockSpec((tile_n, D), lambda p, i: (jnp.where(p == 2, i, 0), 0)),
        scratch_shapes=[
            pltpu.VMEM((n_tiles, tile_n, D), f32),   # h (whole activation, VMEM only)
            pltpu.VMEM((1, D), f32),                 # sum(h) over valid rows
            pltpu.VMEM((1, D), f32),                 # sum((h - mean)^2) over valid rows
        ],
        compiler_params=pltpu.CompilerParams(
            dimension_semantics=("arbitrary", "arbitrary")),
    )(xp, agg, w1p, b1p, w2p, b2p, gp, bp)

    return out_p[:N, :]


# ---------------------------------------------------------------------------
# Pure-JAX reference of the same forward pass.
# ---------------------------------------------------------------------------
def reference(x, edge_attr, src, dst, params):
    w1, b1, w2, b2, gamma, beta = params
    N, D = x.shape
    hp = lax.Precision.HIGHEST
    msg = jnp.maximum(x[src] + edge_attr, 0.0)
    agg = jnp.zeros((N, D), jnp.float32).at[dst].add(msg)
    z = (1.0 + GIN_EPS) * x + agg
    h1 = jnp.maximum(jnp.dot(z, w1, precision=hp) + b1, 0.0)
    h = x + jnp.dot(h1, w2, precision=hp) + b2
    mean = jnp.mean(h, axis=0, keepdims=True)
    var = jnp.mean((h - mean) ** 2, axis=0, keepdims=True)
    return gamma * (h - mean) / jnp.sqrt(var + BN_EPS) + beta


if __name__ == "__main__":
    key = jax.random.PRNGKey(0)
    N, E, D = 16, 48, 32   # nodes, edges, dim_h

    ks = jax.random.split(key, 10)
    x = jax.random.normal(ks[0], (N, D), jnp.float32)
    edge_attr = jax.random.normal(ks[1], (E, D), jnp.float32)
    src = jax.random.randint(ks[2], (E,), 0, N)
    dst = jax.random.randint(ks[3], (E,), 0, N)

    # deterministic synthetic parameters (gin_nn Linear weights/biases, BN affine)
    w1 = jax.random.normal(ks[4], (D, D), jnp.float32) * 0.1
    b1 = jax.random.normal(ks[5], (D,), jnp.float32) * 0.1
    w2 = jax.random.normal(ks[6], (D, D), jnp.float32) * 0.1
    b2 = jax.random.normal(ks[7], (D,), jnp.float32) * 0.1
    gamma = 1.0 + 0.1 * jax.random.normal(ks[8], (D,), jnp.float32)
    beta = 0.1 * jax.random.normal(ks[9], (D,), jnp.float32)
    params = (w1, b1, w2, b2, gamma, beta)

    out = local_model_gine(x, edge_attr, src, dst, params)
    out = jax.block_until_ready(out)

    ref = reference(x, edge_attr, src, dst, params)
    assert out.shape == (N, D)
    err = float(jnp.max(jnp.abs(out - ref)))
    assert jnp.allclose(out, ref, atol=1e-3, rtol=1e-3), f"mismatch vs reference: {err}"
    print("KERNEL_OK")
</pallas_src>

<mosaic_0001>
module attributes {stable_mosaic.version = 11 : i64} {
  func.func @aggregate_kernel(%arg0: i32, %arg1: memref<48x1xi32, #tpu.memory_space<vmem>>, %arg2: memref<1x48xi32, #tpu.memory_space<vmem>>, %arg3: memref<16x32xf32, #tpu.memory_space<vmem>>, %arg4: memref<48x32xf32, #tpu.memory_space<vmem>>, %arg5: memref<16x32xf32, #tpu.memory_space<vmem>>) attributes {dimension_semantics = [#tpu.dimension_semantics<arbitrary>], iteration_bounds = array<i64: 1>, scalar_prefetch = 0 : i64, scratch_operands = 0 : i64, tpu.core_type = #tpu.core_type<tc>, window_params = [{transform_indices = @transform_0, window_bounds = array<i64: 48, 1>}, {transform_indices = @transform_1, window_bounds = array<i64: 1, 48>}, {pipeline_mode = #tpu.pipeline_mode<synchronous>, transform_indices = @transform_2, window_bounds = array<i64: 16, 32>}, {transform_indices = @transform_3, window_bounds = array<i64: 48, 32>}, {pipeline_mode = #tpu.pipeline_mode<synchronous>, transform_indices = @transform_4, window_bounds = array<i64: 16, 32>}]} {
    %c0_i32 = arith.constant 0 : i32
    %0 = arith.cmpi eq, %arg0, %c0_i32 : i32
    %1 = arith.extui %0 : i1 to i32
    %c0_i32_0 = arith.constant 0 : i32
    %2 = arith.cmpi ne, %1, %c0_i32_0 : i32
    scf.if %2 {
      %cst_14 = arith.constant 0.000000e+00 : f32
      %25 = vector.broadcast %cst_14 : f32 to vector<16x32xf32>
      %c0_15 = arith.constant 0 : index
      %c0_16 = arith.constant 0 : index
      %26 = vector.load %arg5[%c0_15, %c0_16] : memref<16x32xf32, #tpu.memory_space<vmem>>, vector<16x32xf32>
      tpu.vector_store %arg5[%c0_15, %c0_16], %25 {strides = array<i32>} : memref<16x32xf32, #tpu.memory_space<vmem>>, vector<16x32xf32>,
    } else {
    }
    %3 = tpu.iota {dimensions = array<i32: 1>} : vector<48x16xi32>
    %c0 = arith.constant 0 : index
    %c0_1 = arith.constant 0 : index
    %4 = vector.load %arg1[%c0, %c0_1] : memref<48x1xi32, #tpu.memory_space<vmem>>, vector<48x1xi32>
    %5 = vector.broadcast %4 : vector<48x1xi32> to vector<48x16xi32>
    %6 = arith.cmpi eq, %3, %5 : vector<48x16xi32>
    %7 = arith.extui %6 : vector<48x16xi1> to vector<48x16xi32>
    %8 = arith.sitofp %7 : vector<48x16xi32> to vector<48x16xf32>
    %c0_2 = arith.constant 0 : index
    %c0_3 = arith.constant 0 : index
    %9 = vector.load %arg3[%c0_2, %c0_3] : memref<16x32xf32, #tpu.memory_space<vmem>>, vector<16x32xf32>
    %cst = arith.constant dense<0.000000e+00> : vector<48x32xf32>
    %10 = tpu.matmul %8, %9, %cst {dimension_numbers = #tpu.dot_dimension_numbers<[1], [0], [0], [1], [0, 0, 1, 1], [], []>, precision = #tpu.contract_precision<fp32>} : vector<48x16xf32>, vector<16x32xf32>, vector<48x32xf32> -> vector<48x32xf32>
    %c0_4 = arith.constant 0 : index
    %c0_5 = arith.constant 0 : index
    %11 = vector.load %arg4[%c0_4, %c0_5] : memref<48x32xf32, #tpu.memory_space<vmem>>, vector<48x32xf32>
    %12 = arith.addf %10, %11 : vector<48x32xf32>
    %cst_6 = arith.constant 0.000000e+00 : f32
    %13 = vector.broadcast %cst_6 : f32 to vector<48x32xf32>
    %14 = arith.maximumf %12, %13 : vector<48x32xf32>
    %15 = tpu.iota {dimensions = array<i32: 0>} : vector<16x48xi32>
    %c0_7 = arith.constant 0 : index
    %c0_8 = arith.constant 0 : index
    %16 = vector.load %arg2[%c0_7, %c0_8] : memref<1x48xi32, #tpu.memory_space<vmem>>, vector<1x48xi32>
    %17 = vector.broadcast %16 : vector<1x48xi32> to vector<16x48xi32>
    %18 = arith.cmpi eq, %15, %17 : vector<16x48xi32>
    %19 = arith.extui %18 : vector<16x48xi1> to vector<16x48xi32>
    %20 = arith.sitofp %19 : vector<16x48xi32> to vector<16x48xf32>
    %c0_9 = arith.constant 0 : index
    %c0_10 = arith.constant 0 : index
    %21 = vector.load %arg5[%c0_9, %c0_10] : memref<16x32xf32, #tpu.memory_space<vmem>>, vector<16x32xf32>
    %cst_11 = arith.constant dense<0.000000e+00> : vector<16x32xf32>
    %22 = tpu.matmul %20, %14, %cst_11 {dimension_numbers = #tpu.dot_dimension_numbers<[1], [0], [0], [1], [0, 0, 1, 1], [], []>, precision = #tpu.contract_precision<fp32>} : vector<16x48xf32>, vector<48x32xf32>, vector<16x32xf32> -> vector<16x32xf32>
    %23 = arith.addf %21, %22 : vector<16x32xf32>
    %c0_12 = arith.constant 0 : index
    %c0_13 = arith.constant 0 : index
    %24 = vector.load %arg5[%c0_12, %c0_13] : memref<16x32xf32, #tpu.memory_space<vmem>>, vector<16x32xf32>
    tpu.vector_store %arg5[%c0_12, %c0_13], %23 {strides = array<i32>} : memref<16x32xf32, #tpu.memory_space<vmem>>, vector<16x32xf32>,
    return
  }
  func.func @transform_0(%arg0: i32) -> (i32, i32) {
    %c0_i32 = arith.constant 0 : i32
    %c0_i32_0 = arith.constant 0 : i32
    return %arg0, %c0_i32 : i32, i32
  }
  func.func @transform_1(%arg0: i32) -> (i32, i32) {
    %c0_i32 = arith.constant 0 : i32
    %c0_i32_0 = arith.constant 0 : i32
    return %c0_i32, %arg0 : i32, i32
  }
  func.func @transform_2(%arg0: i32) -> (i32, i32) {
    %c0_i32 = arith.constant 0 : i32
    %c0_i32_0 = arith.constant 0 : i32
    %c0_i32_1 = arith.constant 0 : i32
    return %c0_i32, %c0_i32_0 : i32, i32
  }
  func.func @transform_3(%arg0: i32) -> (i32, i32) {
    %c0_i32 = arith.constant 0 : i32
    %c0_i32_0 = arith.constant 0 : i32
    return %arg0, %c0_i32 : i32, i32
  }
  func.func @transform_4(%arg0: i32) -> (i32, i32) {
    %c0_i32 = arith.constant 0 : i32
    %c0_i32_0 = arith.constant 0 : i32
    %c0_i32_1 = arith.constant 0 : i32
    return %c0_i32, %c0_i32_0 : i32, i32
  }
}

</mosaic_0001>

<bundles_post_ra>
// kernel: tpu_custom_call.1
= control target key start
LH: loop header
LB: loop body
LE: loop exit
PB: predicated region body
PF: predicated region fallthrough
CT: control target
= control target key end

     0   :  { %v1844_v2 = vmov 0   ;;  %s2082_s0 = inlined_call_operand.vmem [shape: s32[48,1], index: 0, kind: input, shape index: {}]   ;;  %s2083_s1 = inlined_call_operand.vmem [shape: s32[1,48], index: 1, kind: input, shape index: {}]   ;;  %s2084_s2 = inlined_call_operand.vmem [shape: f32[16,32], index: 2, kind: input, shape index: {}]   ;;  %s2085_s3 = inlined_call_operand.vmem [shape: f32[48,32], index: 3, kind: input, shape index: {}]   ;;  %s2086_s4 = inlined_call_operand.hbm [shape: f32[16,32], index: 4, kind: output, shape index: {}]  }
   0x1   :  { %v29_v0 = vld [vmem:[%s2082_s0 + $0x10] sm:$0xff]  ;;  %v27_v1 = vld [vmem:[%s2082_s0] sm:$0xff]  ;;  %1819 = vset.pattern.permute.xlu1 %v1844_v2  ;;  %1818 = vset.pattern.permute.xlu0 %v1844_v2 }
   0x2   :  { %40 = vperm.xlu1 %1819, %v29_v0   ;;  %34 = vperm.xlu0 %1818, %v27_v1  }
   0x3   :  { %9 = vsyncpa [#allocation3], 0  ;;  %v30_v3 = vld [vmem:[%s2082_s0 + $0x18] sm:$0xff]  ;;  %v28_v4 = vld [vmem:[%s2082_s0 + $0x8] sm:$0xff]  ;;  %v25_v23 = vlaneseq  ;;  %vm77_vm0 = vcmask 130048   ;;  %v1845_v27 = vmov 0.0  }
   0x4   :  { %v32_v5 = vld [vmem:[%s2082_s0 + $0x28] sm:$0xff]  ;;  %v31_v6 = vld [vmem:[%s2082_s0 + $0x20] sm:$0xff]  ;;  %vm792_vm9 = vcmask 392192   ;;  %vm22_vm10 = vcmask 261120  }
   0x5   :  { %v69_v7 = vld [vmem:[%s2084_s2] sm:$0xff]  ;;  %v70_v8 = vld [vmem:[%s2084_s2 + $0x8] sm:$0xff]  ;;  %v26_v24 = vand.u32 127, %v25_v23  ;;  %24 = vst.msk [vmem:[#allocation2 + $0x8] sm:$0xff] %vm22_vm10, %v1845_v27  ;;  %23 = vst.msk [vmem:[#allocation2] sm:$0xff] %vm22_vm10, %v1845_v27 }
   0x6   :  { %43 = vperm.xlu1 %1819, %v30_v3   ;;  %37 = vperm.xlu0 %1818, %v28_v4   ;;  %v97_v9 = vand.u32 4294901760, %v69_v7  ;;  %v100_v10 = vand.u32 4294901760, %v70_v8  ;;  %v777_v4 = vshrl.u32 %v25_v23, 7  ;;  %v73_v23 = vld [vmem:[%s2085_s3 + $0x10] sm:$0xff] }
   0x8   :  { %v1898_v11 = vpack.c.bf16 %v100_v10, %v97_v9  ;;  %v225_v12 = vsub.f32 %v69_v7, %v97_v9  ;;  %v232_v13 = vsub.f32 %v70_v8, %v100_v10 }
   0xa   :  { %49 = vperm.xlu1 %1819, %v32_v5   ;;  %46 = vperm.xlu0 %1818, %v31_v6   ;;  %v226_v14 = vand.u32 4294901760, %v225_v12  ;;  %v233_v15 = vand.u32 4294901760, %v232_v13  ;;  %v1902_v21 = vpack.c.bf16 %v232_v13, %v225_v12  ;;  %v778_v5 = vadd.s32 8, %v777_v4  ;;  %v1398_v6 = vld [vmem:[%s2083_s1] ss:$0 sm:$0xff] }
   0xb   :  { %1672 = vmatprep.subr.bf16.mxu0 %v1898_v11  ;;  %vm784_vm7 = vcmp.eq.s32.totalorder %v777_v4, %v1398_v6 }
   0xc   :  { %1674 = vmatpush3.bf16.msra.mxu0 %v1898_v11  ;;  %v227_v16 = vsub.f32 %v225_v12, %v226_v14  ;;  %v234_v17 = vsub.f32 %v232_v13, %v233_v15  ;;  %v1904_v22 = vpack.c.bf16 %v233_v15, %v226_v14  ;;  %vm785_vm8 = vcmp.eq.s32.totalorder %v778_v5, %v1398_v6  ;;  %v72_v14 = vld [vmem:[%s2085_s3 + $0x8] sm:$0xff]  ;;  %v71_v15 = vld [vmem:[%s2085_s3] sm:$0xff] }
   0xd   :  { %v1991_v7 = vsel %vm784_vm7, 1.0, %v1845_v27  ;;  %v2006_v13 = vsel %vm785_vm8, 1.0, %v1845_v27 }
   0xe   :  { %v228_v18 = vand.u32 4294901760, %v227_v16  ;;  %v235_v19 = vand.u32 4294901760, %v234_v17  ;;  %v794_v8 = vsel %vm792_vm9, %v1991_v7, 0  ;;  %v797_v17 = vsel %vm792_vm9, %v2006_v13, 0 }
   0xf   :  { %v1995_v9 = vsub.f32 %v794_v8, %v794_v8 }
  0x10   :  { %v1675_v20 = vpack.c.bf16 %v235_v19, %v228_v18 }
  0x11   :  { %v872_v10 = vand.u32 4294901760, %v1995_v9 }
  0x12   :  { %1676 = vmatprep.subr.bf16.mxu0 %v1675_v20 }
  0x81   :  { %v41_v25 = vpop.permute.xlu1 %40  ;;  %v35_v26 = vpop.permute.xlu0 %34 }
  0x82   :  { %vm53_vm1 = vcmp.eq.s32.totalorder %v26_v24, %v41_v25  ;;  %vm51_vm2 = vcmp.eq.s32.totalorder %v26_v24, %v35_v26 }
  0x83   :  { %v1908_v28 = vsel %vm53_vm1, 1.0, %v1845_v27  ;;  %v1911_v29 = vsel %vm51_vm2, 1.0, %v1845_v27 }
  0x84   :  { %v85_v30 = vsel %vm77_vm0, %v1908_v28, 0  ;;  %v79_v31 = vsel %vm77_vm0, %v1911_v29, 0 }
  0x85   :  { %v1917_v32 = vsub.f32 %v85_v30, %v85_v30  ;;  %v44_v33 = vpop.permute.xlu1 %43  ;;  %v38_v34 = vpop.permute.xlu0 %37  ;;  %v164_v35 = vsub.f32 %v79_v31, %v79_v31 }
  0x86   :  { %vm54_vm3 = vcmp.eq.s32.totalorder %v26_v24, %v44_v33  ;;  %vm52_vm4 = vcmp.eq.s32.totalorder %v26_v24, %v38_v34 }
  0x87   :  { %v1920_v36 = vsel %vm54_vm3, 1.0, %v1845_v27  ;;  %v1923_v37 = vsel %vm52_vm4, 1.0, %v1845_v27  ;;  %v165_v38 = vand.u32 4294901760, %v164_v35  ;;  %v185_v41 = vand.u32 4294901760, %v1917_v32 }
  0x88   :  { %v88_v39 = vsel %vm77_vm0, %v1920_v36, 0  ;;  %v82_v40 = vsel %vm77_vm0, %v1923_v37, 0 }
  0x89   :  { %v194_v42 = vsub.f32 %v88_v39, %v88_v39  ;;  %v174_v43 = vsub.f32 %v82_v40, %v82_v40  ;;  %v50_v44 = vpop.permute.xlu1 %49  ;;  %v47_v45 = vpop.permute.xlu0 %46  ;;  %v166_v46 = vsub.f32 %v164_v35, %v165_v38  ;;  %v186_v53 = vsub.f32 %v1917_v32, %v185_v41 }
  0x8a   :  { %vm56_vm5 = vcmp.eq.s32.totalorder %v26_v24, %v50_v44  ;;  %vm55_vm6 = vcmp.eq.s32.totalorder %v26_v24, %v47_v45  ;;  %v2022_v24 = vsub.f32 %v797_v17, %v797_v17 }
  0x8b   :  { %v1931_v47 = vsel %vm56_vm5, 1.0, %v1845_v27  ;;  %v1934_v48 = vsel %vm55_vm6, 1.0, %v1845_v27  ;;  %v167_v49 = vand.u32 4294901760, %v166_v46  ;;  %v175_v50 = vand.u32 4294901760, %v174_v43 }
  0x8c   :  { %v94_v51 = vsel %vm77_vm0, %v1931_v47, 0  ;;  %v91_v52 = vsel %vm77_vm0, %v1934_v48, 0  ;;  %v195_v54 = vand.u32 4294901760, %v194_v42  ;;  %v187_v62 = vand.u32 4294901760, %v186_v53 }
  0x8d   :  { %v214_v55 = vsub.f32 %v94_v51, %v94_v51  ;;  %v204_v56 = vsub.f32 %v91_v52, %v91_v52  ;;  %1507 = vmatprep.mubr.f32.mxu0 %v167_v49  ;;  %v176_v57 = vsub.f32 %v174_v43, %v175_v50 }
  0x8e   :  { %v196_v59 = vsub.f32 %v194_v42, %v195_v54 }
  0x8f   :  { %v177_v58 = vand.u32 4294901760, %v176_v57  ;;  %v205_v60 = vand.u32 4294901760, %v204_v56  ;;  %v215_v61 = vand.u32 4294901760, %v214_v55 }
  0x90   :  { %v197_v0 = vand.u32 4294901760, %v196_v59 }
  0x91   :  { %1508 = vmatmul.mubr.f32.vlgmr.msra.gmra.mrb[0].mxu0 %v177_v58  ;;  %v206_v63 = vsub.f32 %v204_v56, %v205_v60  ;;  %v216_v2 = vsub.f32 %v214_v55, %v215_v61 }
  0x92   :  { %1678 = vmatpush3.bf16.msra.mxu0 %v1675_v20  ;;  %1510 = vmatprep.mubr.f32.mxu0 %v187_v62 }
  0x93   :  { %v207_v1 = vand.u32 4294901760, %v206_v63  ;;  %1680 = vmatprep.subr.bf16.mxu0 %v1902_v21  ;;  %v217_v3 = vand.u32 4294901760, %v216_v2 }
  0x95   :  { %1511 = vmatmul.mubr.f32.gmra.mrb[2].mxu0 %v197_v0 }
  0x96   :  { %1513 = vmatprep.mubr.f32.mxu0 %v207_v1 }
  0x99   :  { %1514 = vmatmul.mubr.f32.gmra.mrb[4].mxu0 %v217_v3 }
  0x9a   :  { %1520 = vmatprep.mubr.msk.f32.mxu0 %vm77_vm0, %v1911_v29 }
  0x9d   :  { %1521 = vmatmul.mubr.msk.f32.vlgmr.msra.gmra.mrb[0].mxu0 %vm77_vm0, %v1923_v37 }
  0x9e   :  { %1682 = vmatpush3.bf16.msra.mxu0 %v1902_v21  ;;  %1523 = vmatprep.mubr.msk.f32.mxu0 %vm77_vm0, %v1908_v28  ;;  %v74_v21 = vld [vmem:[%s2085_s3 + $0x18] sm:$0xff] }
  0x9f   :  { %1684 = vmatprep.subr.bf16.mxu0 %v1898_v11 }
  0xa1   :  { %1524 = vmatmul.mubr.msk.f32.gmra.mrb[2].mxu0 %vm77_vm0, %v1920_v36 }
  0xa2   :  { %1526 = vmatprep.mubr.msk.f32.mxu0 %vm77_vm0, %v1934_v48 }
  0xa5   :  { %1527 = vmatmul.mubr.msk.f32.gmra.mrb[4].mxu0 %vm77_vm0, %v1931_v47 }
  0xa6   :  { %1533 = vmatprep.mubr.f32.mxu0 %v164_v35  ;;  %v75_v35 = vld [vmem:[%s2085_s3 + $0x20] sm:$0xff] }
  0xa9   :  { %1534 = vmatmul.mubr.f32.vlgmr.msra.gmra.mrb[0].mxu0 %v174_v43 }
  0xaa   :  { %1686 = vmatpush3.bf16.msra.mxu0 %v1898_v11  ;;  %1536 = vmatprep.mubr.f32.mxu0 %v1917_v32  ;;  %v76_v32 = vld [vmem:[%s2085_s3 + $0x28] sm:$0xff]  ;;  %s1846_s3 = smov [#allocation2]  }
  0xab   :  { %1688 = vmatprep.subr.bf16.mxu0 %v1904_v22  ;;  %s1363_s16 = sshll.u32 %s1846_s3, 4  ;;  %s1364_s16 = int_to_ptr.vmem [resolvable:$true] %s1363_s16 }
  0xac   :  { %s1820_s17 = scalar_lea.vmem %s1364_s16, 256  ;;  %p1825_p1 = scmp.lt.s32.totalorder %s1364_s16, %s1364_s16 }
  0xad   :  { %1537 = vmatmul.mubr.f32.gmra.mrb[2].mxu0 %v194_v42  ;;  %p1821_p0 = scmp.ne.s32.totalorder %s1364_s16, %s1820_s17  ;;  %p1826_p2 = scmp.lt.s32.totalorder %s1820_s17, %s1820_s17 }
  0xae   :  { %1539 = vmatprep.mubr.f32.mxu0 %v204_v56 }
  0xaf   :  { %p1827_p3 = por %p1826_p2, %p1825_p1 }
  0xb1   :  { %1540 = vmatmul.mubr.f32.gmra.mrb[4].mxu0 %v214_v55  ;;  %p1828_p4 = pnand %p1827_p3, %p1821_p0 }
  0xb2   :  { %1546 = vmatprep.mubr.f32.mxu0 %v165_v38 }
  0xb5   :  { %1547 = vmatmul.mubr.f32.vlgmr.msra.gmra.mrb[0].mxu0 %v175_v50 }
  0xb6   :  { %1690 = vmatpush3.bf16.msra.mxu0 %v1904_v22  ;;  %1549 = vmatprep.mubr.f32.mxu0 %v185_v41 }
  0xb7   :  { %1692 = vmatprep.subr.bf16.mxu0 %v1898_v11 }
  0xb9   :  { %1550 = vmatmul.mubr.f32.gmra.mrb[2].mxu0 %v195_v54 }
  0xba   :  { %1552 = vmatprep.mubr.f32.mxu0 %v205_v60 }
  0xbd   :  { %1553 = vmatmul.mubr.f32.gmra.mrb[4].mxu0 %v215_v61 }
  0xbe   :  { %1559 = vmatprep.mubr.msk.f32.mxu0 %vm77_vm0, %v1911_v29 }
  0xc1   :  { %1560 = vmatmul.mubr.msk.f32.vlgmr.msra.gmra.mrb[0].mxu0 %vm77_vm0, %v1923_v37 }
  0xc2   :  { %1694 = vmatpush3.bf16.msra.mxu0 %v1898_v11  ;;  %1562 = vmatprep.mubr.msk.f32.mxu0 %vm77_vm0, %v1908_v28  ;;  %v873_v11 = vsub.f32 %v1995_v9, %v872_v10 }
  0xc4   :  { %v874_v12 = vand.u32 4294901760, %v873_v11 }
  0xc5   :  { %1563 = vmatmul.mubr.msk.f32.gmra.mrb[2].mxu0 %vm77_vm0, %v1920_v36 }
  0xc6   :  { %1565 = vmatprep.mubr.msk.f32.mxu0 %vm77_vm0, %v1934_v48  ;;  %1593 = vmatprep.mubr.f32.mxu1 %v874_v12 }
  0xc9   :  { %1566 = vmatmul.mubr.msk.f32.gmra.mrb[4].mxu0 %vm77_vm0, %v1931_v47 }
  0xca   :  { %1572 = vmatprep.mubr.msk.f32.mxu0 %vm77_vm0, %v1911_v29 }
  0xcd   :  { %1573 = vmatmul.mubr.msk.f32.vlgmr.msra.gmra.mrb[0].mxu0 %vm77_vm0, %v1923_v37 }
  0xce   :  { %1575 = vmatprep.mubr.msk.f32.mxu0 %vm77_vm0, %v1908_v28 }
  0xd1   :  { %1576 = vmatmul.mubr.msk.f32.gmra.mrb[2].mxu0 %vm77_vm0, %v1920_v36  ;;  %v882_v36 = vand.u32 4294901760, %v2022_v24 }
  0xd2   :  { %1578 = vmatprep.mubr.msk.f32.mxu0 %vm77_vm0, %v1934_v48 }
  0xd3   :  { %v883_v52 = vsub.f32 %v2022_v24, %v882_v36 }
  0xd5   :  { %1579 = vmatmul.mubr.msk.f32.gmra.mrb[4].mxu0 %vm77_vm0, %v1931_v47 }
 0x1a0   :  { %v1574_v16 = vpop.f32.mrb[0].mxu0 }
 0x1a1   :  { %v1767_v18 = vadd.f32 %v1574_v16, %v72_v14  ;;  %v736_v19 = vpop.f32.mrb[1].mxu0 }
 0x1a2   :  { %v1768_v20 = vadd.f32 %v736_v19, %v71_v15  ;;  %v884_v15 = vand.u32 4294901760, %v883_v52 }
 0x1a3   :  { %v771_v22 = vmax.f32 %v1767_v18, 0.0 }
 0x1a4   :  { %v770_v25 = vmax.f32 %v1768_v20, 0.0  ;;  %v1577_v26 = vpop.f32.mrb[2].mxu0 }
 0x1a5   :  { %v803_v27 = vand.u32 4294901760, %v771_v22  ;;  %v1769_v28 = vadd.f32 %v1577_v26, %v74_v21  ;;  %v748_v29 = vpop.f32.mrb[3].mxu0 }
 0x1a6   :  { %v800_v30 = vand.u32 4294901760, %v770_v25  ;;  %v1770_v31 = vadd.f32 %v748_v29, %v73_v23 }
 0x1a7   :  { %v899_v33 = vsub.f32 %v771_v22, %v803_v27  ;;  %v773_v34 = vmax.f32 %v1769_v28, 0.0 }
 0x1a8   :  { %v2031_v37 = vpack.c.bf16 %v803_v27, %v800_v30  ;;  %v892_v38 = vsub.f32 %v770_v25, %v800_v30  ;;  %v772_v39 = vmax.f32 %v1770_v31, 0.0  ;;  %v1580_v40 = vpop.f32.mrb[4].mxu0 }
 0x1a9   :  { %v900_v41 = vand.u32 4294901760, %v899_v33  ;;  %v809_v42 = vand.u32 4294901760, %v773_v34  ;;  %v1771_v43 = vadd.f32 %v1580_v40, %v76_v32  ;;  %v760_v44 = vpop.f32.mrb[5].mxu0 }
 0x1aa   :  { %v893_v45 = vand.u32 4294901760, %v892_v38  ;;  %v806_v46 = vand.u32 4294901760, %v772_v39  ;;  %v1772_v47 = vadd.f32 %v760_v44, %v75_v35  ;;  %1696 = vmatprep.subr.bf16.mxu1 %v2031_v37  ;;  %v1719_v48 = vpack.c.bf16 %v899_v33, %v892_v38 }
 0x1ab   :  { %v913_v49 = vsub.f32 %v773_v34, %v809_v42  ;;  %v775_v50 = vmax.f32 %v1771_v43, 0.0  ;;  %1698 = vmatpush3.bf16.msra.mxu1 %v2031_v37  ;;  %v901_v51 = vsub.f32 %v899_v33, %v900_v41 }
 0x1ac   :  { %v2038_v53 = vpack.c.bf16 %v809_v42, %v806_v46  ;;  %v906_v54 = vsub.f32 %v772_v39, %v806_v46  ;;  %v774_v55 = vmax.f32 %v1772_v47, 0.0  ;;  %v894_v56 = vsub.f32 %v892_v38, %v893_v45 }
 0x1ad   :  { %v914_v57 = vand.u32 4294901760, %v913_v49  ;;  %v815_v58 = vand.u32 4294901760, %v775_v50  ;;  %v902_v59 = vand.u32 4294901760, %v901_v51  ;;  %v1743_v60 = vpack.c.bf16 %v900_v41, %v893_v45 }
 0x1ae   :  { %v907_v61 = vand.u32 4294901760, %v906_v54  ;;  %v812_v62 = vand.u32 4294901760, %v774_v55  ;;  %1700 = vmatprep.subr.bf16.mxu1 %v2038_v53  ;;  %v895_v63 = vand.u32 4294901760, %v894_v56  ;;  %v1723_v0 = vpack.c.bf16 %v913_v49, %v906_v54 }
 0x1af   :  { %v927_v1 = vsub.f32 %v775_v50, %v815_v58  ;;  %1702 = vmatpush3.bf16.msra.mxu1 %v2038_v53  ;;  %v915_v2 = vsub.f32 %v913_v49, %v914_v57 }
 0x1b0   :  { %v1703_v3 = vpack.c.bf16 %v815_v58, %v812_v62  ;;  %v920_v4 = vsub.f32 %v774_v55, %v812_v62  ;;  %v1707_v5 = vpack.c.bf16 %v902_v59, %v895_v63  ;;  %v908_v6 = vsub.f32 %v906_v54, %v907_v61 }
 0x1b1   :  { %v928_v8 = vand.u32 4294901760, %v927_v1  ;;  %v916_v11 = vand.u32 4294901760, %v915_v2  ;;  %v1747_v12 = vpack.c.bf16 %v914_v57, %v907_v61 }
 0x1b2   :  { %v921_v14 = vand.u32 4294901760, %v920_v4  ;;  %1704 = vmatprep.subr.bf16.mxu1 %v1703_v3  ;;  %v909_v16 = vand.u32 4294901760, %v908_v6  ;;  %v1727_v17 = vpack.c.bf16 %v927_v1, %v920_v4 }
 0x1b3   :  { %1706 = vmatpush3.bf16.msra.mxu1 %v1703_v3  ;;  %v929_v18 = vsub.f32 %v927_v1, %v928_v8 }
 0x1b4   :  { %1708 = vmatprep.subr.bf16.mxu1 %v1707_v5  ;;  %v1711_v19 = vpack.c.bf16 %v916_v11, %v909_v16  ;;  %v922_v20 = vsub.f32 %v920_v4, %v921_v14  ;;  %v1751_v21 = vpack.c.bf16 %v928_v8, %v921_v14 }
 0x1b5   :  { %v930_v22 = vand.u32 4294901760, %v929_v18 }
 0x1b6   :  { %1594 = vmatmul.mubr.f32.vlgmr.msra.gmra.mrb[0].mxu1 %v884_v15  ;;  %v923_v23 = vand.u32 4294901760, %v922_v20 }
 0x1b7   :  { %1710 = vmatpush3.bf16.msra.mxu1 %v1707_v5  ;;  %1608 = vmatprep.mubr.msk.f32.mxu1 %vm792_vm9, %v1991_v7 }
 0x1b8   :  { %1712 = vmatprep.subr.bf16.mxu1 %v1711_v19  ;;  %v1715_v25 = vpack.c.bf16 %v930_v22, %v923_v23 }
 0x1bb   :  { %1714 = vmatpush3.bf16.msra.mxu1 %v1711_v19 }
 0x1bc   :  { %1716 = vmatprep.subr.bf16.mxu1 %v1715_v25 }
 0x1bf   :  { %1718 = vmatpush3.bf16.msra.mxu1 %v1715_v25 }
 0x1c0   :  { %1720 = vmatprep.subr.bf16.mxu1 %v1719_v48 }
 0x1c2   :  { %1609 = vmatmul.mubr.msk.f32.vlgmr.msra.gmra.mrb[0].mxu1 %vm792_vm9, %v2006_v13 }
 0x1c3   :  { %1722 = vmatpush3.bf16.msra.mxu1 %v1719_v48  ;;  %1623 = vmatprep.mubr.f32.mxu1 %v1995_v9  ;;  %v791_v9 = vld [vmem:[#allocation2 + $0x8] sm:$0xff] }
 0x1c4   :  { %1724 = vmatprep.subr.bf16.mxu1 %v1723_v0 }
 0x1c7   :  { %1726 = vmatpush3.bf16.msra.mxu1 %v1723_v0 }
 0x1c8   :  { %1728 = vmatprep.subr.bf16.mxu1 %v1727_v17 }
 0x1cb   :  { %1730 = vmatpush3.bf16.msra.mxu1 %v1727_v17 }
 0x1cc   :  { %1732 = vmatprep.subr.bf16.mxu1 %v2031_v37 }
 0x1ce   :  { %1624 = vmatmul.mubr.f32.vlgmr.msra.gmra.mrb[0].mxu1 %v2022_v24 }
 0x1cf   :  { %1734 = vmatpush3.bf16.msra.mxu1 %v2031_v37  ;;  %1638 = vmatprep.mubr.f32.mxu1 %v872_v10  ;;  %v790_v10 = vld [vmem:[#allocation2] sm:$0xff] }
 0x1d0   :  { %1736 = vmatprep.subr.bf16.mxu1 %v2038_v53 }
 0x1d3   :  { %1738 = vmatpush3.bf16.msra.mxu1 %v2038_v53 }
 0x1d4   :  { %1740 = vmatprep.subr.bf16.mxu1 %v1703_v3 }
 0x1d7   :  { %1742 = vmatpush3.bf16.msra.mxu1 %v1703_v3 }
 0x1d8   :  { %1744 = vmatprep.subr.bf16.mxu1 %v1743_v60 }
 0x1da   :  { %1639 = vmatmul.mubr.f32.vlgmr.msra.gmra.mrb[0].mxu1 %v882_v36 }
 0x1db   :  { %1746 = vmatpush3.bf16.msra.mxu1 %v1743_v60  ;;  %1653 = vmatprep.mubr.msk.f32.mxu1 %vm792_vm9, %v1991_v7 }
 0x1dc   :  { %1748 = vmatprep.subr.bf16.mxu1 %v1747_v12 }
 0x1df   :  { %1750 = vmatpush3.bf16.msra.mxu1 %v1747_v12 }
 0x1e0   :  { %1752 = vmatprep.subr.bf16.mxu1 %v1751_v21 }
 0x1e3   :  { %1754 = vmatpush3.bf16.msra.mxu1 %v1751_v21 }
 0x1e4   :  { %1756 = vmatprep.subr.bf16.mxu1 %v2031_v37 }
 0x1e6   :  { %1654 = vmatmul.mubr.msk.f32.vlgmr.msra.gmra.mrb[0].mxu1 %vm792_vm9, %v2006_v13 }
 0x1e7   :  { %1758 = vmatpush3.bf16.msra.mxu1 %v2031_v37  ;;  %1668 = vmatprep.mubr.msk.f32.mxu1 %vm792_vm9, %v1991_v7 }
 0x1e8   :  { %1760 = vmatprep.subr.bf16.mxu1 %v2038_v53 }
 0x1eb   :  { %1762 = vmatpush3.bf16.msra.mxu1 %v2038_v53 }
 0x1ec   :  { %1764 = vmatprep.subr.bf16.mxu1 %v1703_v3 }
 0x1ef   :  { %1766 = vmatpush3.bf16.msra.mxu1 %v1703_v3 }
 0x1f2   :  { %1669 = vmatmul.mubr.msk.f32.vlgmr.msra.gmra.mrb[0].mxu1 %vm792_vm9, %v2006_v13 }
 0x2c5   :  { %v1670_v24 = vpop.f32.mrb[0].mxu1 }
 0x2c6   :  { %v1354_v26 = vadd.f32 %v1670_v24, %v791_v9  ;;  %v1343_v27 = vpop.f32.mrb[1].mxu1 }
 0x2c7   :  { %v1353_v28 = vadd.f32 %v1343_v27, %v790_v10 }
 0x2c8   :  { %1357 = vst.msk [vmem:[#allocation2 + $0x8] sm:$0xff] %vm22_vm10, %v1354_v26 }
 0x2c9   :  { %1356 = vst.msk [vmem:[#allocation2] sm:$0xff] %vm22_vm10, %v1353_v28 }
 0x2ca   :  { %1831 = shalt.err (!%p1828_p4)
}
 0x2cb   :  { %s1832_s20 = scalar_lea.hbm %s2086_s4, 256 }
 0x2cc   :  { %p1833_p5 = scmp.ne.s32.totalorder %s2086_s4, %s1832_s20  ;;  %p1836_p6 = scmp.lt.u32.totalorder %s1832_s20, %s2086_s4 }
 0x2ce   :  { %p1838_p7 = pnand %p1836_p6, %p1833_p5 }
 0x2d0   :  { %1841 = shalt.err (!%p1838_p7)
}
 0x2d1   :  { %s1847_s25 = smov 128   ;;  %s1848_s26 = smov 8  }
 0x2d2   :  { %1369 = dma.vmem_to_hbm [thread:$0]  %s1364_s16, 256, %s2086_s4, [#allocation3], %s1847_s25, %s1847_s25, %s1848_s26  }
 0x2d3   :  { %1842 = dma.done.wait [#allocation3], 256  }
 0x2d4   :  { %1843 = vsyncadd [#allocation3], 4294967040 }
 0x2d5   :  { %1373 = vsyncpa [#allocation3], 1 }

</bundles_post_ra>
